<compile_context>
chip_gen: v6e
topology: v6e:2x2x1
jax: 0.10.0
libtpu: 0.0.40
codegen_flags: <defaults>
</compile_context>

<pallas_src>
import jax
import jax.numpy as jnp
from jax.experimental import pallas as pl
from jax.experimental.pallas import tpu as pltpu


def _fused_1x1_kernel(x_ref, w_ref, b_ref, o_ref):
    # x_ref: (1, C_IN, HW_BLK) VMEM tile (one image, channel-major pixels).
    # w_ref: (C_OUT, C_IN) fused weight in SMEM.
    # b_ref: (C_OUT,)      fused bias   in SMEM.
    # o_ref: (1, C_OUT, HW_BLK) VMEM output tile (lane-dense last dim).
    c_in = x_ref.shape[1]
    c_out = o_ref.shape[1]

    x = x_ref[0]  # (C_IN, HW_BLK)
    for o in range(c_out):
        # y[o, :] = sum_c w[o, c] * x[c, :] + b[o]   -- VPU broadcast FMAs.
        acc = x[0:1, :] * w_ref[o, 0]
        for c in range(1, c_in):
            acc = acc + x[c:c+1, :] * w_ref[o, c]
        o_ref[0, o:o+1, :] = acc + b_ref[o]


def nn_test_single_forward(x_nchw, w1, b1, w2, b2, *, hw_block_cap=2048):
    """Forward pass of NNTestSingle.

    x_nchw: (N, 3, H, W) float32
    w1: (6, 3) conv1 weight (1x1 kernel squeezed), b1: (6,)
    w2: (3, 6) conv2 weight,                       b2: (3,)
    Returns (N, 3, H, W).
    """
    n, c_in, h, w = x_nchw.shape
    c_out = w2.shape[0]

    # Fuse the two affine layers (no nonlinearity in between).
    w_eff = (w2 @ w1).astype(jnp.float32)        # (c_out, c_in) = (3, 3)
    b_eff = (w2 @ b1 + b2).astype(jnp.float32)   # (c_out,)      = (3,)

    hw = h * w
    x3 = x_nchw.reshape(n, c_in, hw)             # pure reshape, no transpose

    # Lane-dense spatial blocking: block is a multiple of 128 (or the whole
    # padded spatial extent), capped so tiles stay tiny even on v7x VMEM.
    if hw >= hw_block_cap:
        hw_blk = hw_block_cap
    else:
        hw_blk = pl.cdiv(hw, 128) * 128
    n_sblk = pl.cdiv(hw, hw_blk)
    hw_pad = n_sblk * hw_blk
    if hw_pad != hw:
        x3 = jnp.pad(x3, ((0, 0), (0, 0), (0, hw_pad - hw)))

    grid = (n, n_sblk)
    out = pl.pallas_call(
        _fused_1x1_kernel,
        out_shape=jax.ShapeDtypeStruct((n, c_out, hw_pad), x3.dtype),
        grid_spec=pltpu.PrefetchScalarGridSpec(
            num_scalar_prefetch=0,
            grid=grid,
            in_specs=[
                pl.BlockSpec((1, c_in, hw_blk), lambda i, s: (i, 0, s)),
                # Fused 3x3 weight + 3-entry bias live in SMEM as scalars.
                pl.BlockSpec(memory_space=pltpu.MemorySpace.SMEM),
                pl.BlockSpec(memory_space=pltpu.MemorySpace.SMEM),
            ],
            out_specs=pl.BlockSpec((1, c_out, hw_blk), lambda i, s: (i, 0, s)),
        ),
        compiler_params=pltpu.CompilerParams(
            # Every output block is written exactly once -> both axes parallel
            # (lets v7x shard over its two TensorCores; no-op on v5e/v6e).
            dimension_semantics=("parallel", "parallel"),
        ),
    )(x3, w_eff, b_eff)

    if hw_pad != hw:
        out = out[:, :, :hw]
    return out.reshape(n, c_out, h, w)


def _reference(x_nchw, w1, b1, w2, b2):
    # Pure-JAX reference of the ORIGINAL two-layer module (unfused), in NCHW.
    h = jnp.einsum("nchw,oc->nohw", x_nchw, w1) + b1[None, :, None, None]
    y = jnp.einsum("nchw,oc->nohw", h, w2) + b2[None, :, None, None]
    return y


if __name__ == "__main__":
    key = jax.random.PRNGKey(0)
    k_x, k_w1, k_b1, k_w2, k_b2 = jax.random.split(key, 5)

    # Small shapes consistent with the module: batch=2, in_ch=3, spatial=16x16.
    x = jax.random.normal(k_x, (2, 3, 16, 16), dtype=jnp.float32)

    # Deterministic parameter init (PyTorch-like uniform scale), 1x1 kernels
    # stored squeezed as (out_ch, in_ch).
    w1 = jax.random.uniform(k_w1, (6, 3), jnp.float32, -0.5, 0.5)
    b1 = jax.random.uniform(k_b1, (6,), jnp.float32, -0.5, 0.5)
    w2 = jax.random.uniform(k_w2, (3, 6), jnp.float32, -0.4, 0.4)
    b2 = jax.random.uniform(k_b2, (3,), jnp.float32, -0.4, 0.4)

    out = nn_test_single_forward(x, w1, b1, w2, b2)
    out = jax.block_until_ready(out)

    ref = _reference(x, w1, b1, w2, b2)
    assert out.shape == (2, 3, 16, 16), out.shape
    assert jnp.allclose(out, ref, atol=1e-5, rtol=1e-5), "mismatch vs reference"

    print("KERNEL_OK")
</pallas_src>

<mosaic_0001>
module attributes {stable_mosaic.version = 11 : i64} {
  func.func @_fused_1x1_kernel(%arg0: i32, %arg1: i32, %arg2: memref<1x3x256xf32, #tpu.memory_space<vmem>>, %arg3: memref<3x3xf32, #tpu.memory_space<smem>>, %arg4: memref<3xf32, #tpu.memory_space<smem>>, %arg5: memref<1x3x256xf32, #tpu.memory_space<vmem>>) attributes {dimension_semantics = [#tpu.dimension_semantics<parallel>, #tpu.dimension_semantics<parallel>], iteration_bounds = array<i64: 2, 1>, scalar_prefetch = 0 : i64, scratch_operands = 0 : i64, tpu.core_type = #tpu.core_type<tc>, window_params = [{transform_indices = @transform_0, window_bounds = array<i64: 1, 3, 256>}, {transform_indices = @transform_1, window_bounds = array<i64: 3, 3>}, {transform_indices = @transform_2, window_bounds = array<i64: 3>}, {transform_indices = @transform_3, window_bounds = array<i64: 1, 3, 256>}]} {
    %c0 = arith.constant 0 : index
    %c0_0 = arith.constant 0 : index
    %c0_1 = arith.constant 0 : index
    %0 = vector.load %arg2[%c0, %c0_0, %c0_1] : memref<1x3x256xf32, #tpu.memory_space<vmem>>, vector<1x3x256xf32>
    %1 = vector.shape_cast %0 : vector<1x3x256xf32> to vector<3x256xf32>
    %2 = vector.extract_strided_slice %1 {offsets = [0, 0], sizes = [1, 256], strides = [1, 1]} : vector<3x256xf32> to vector<1x256xf32>
    %c0_2 = arith.constant 0 : index
    %c0_3 = arith.constant 0 : index
    %3 = memref.load %arg3[%c0_2, %c0_3] : memref<3x3xf32, #tpu.memory_space<smem>>
    %4 = vector.broadcast %3 : f32 to vector<1x256xf32>
    %5 = arith.mulf %2, %4 : vector<1x256xf32>
    %6 = vector.extract_strided_slice %1 {offsets = [1, 0], sizes = [1, 256], strides = [1, 1]} : vector<3x256xf32> to vector<1x256xf32>
    %c0_4 = arith.constant 0 : index
    %c1 = arith.constant 1 : index
    %7 = memref.load %arg3[%c0_4, %c1] : memref<3x3xf32, #tpu.memory_space<smem>>
    %8 = vector.broadcast %7 : f32 to vector<1x256xf32>
    %9 = arith.mulf %6, %8 : vector<1x256xf32>
    %10 = arith.addf %5, %9 : vector<1x256xf32>
    %11 = vector.extract_strided_slice %1 {offsets = [2, 0], sizes = [1, 256], strides = [1, 1]} : vector<3x256xf32> to vector<1x256xf32>
    %c0_5 = arith.constant 0 : index
    %c2 = arith.constant 2 : index
    %12 = memref.load %arg3[%c0_5, %c2] : memref<3x3xf32, #tpu.memory_space<smem>>
    %13 = vector.broadcast %12 : f32 to vector<1x256xf32>
    %14 = arith.mulf %11, %13 : vector<1x256xf32>
    %15 = arith.addf %10, %14 : vector<1x256xf32>
    %c0_6 = arith.constant 0 : index
    %16 = memref.load %arg4[%c0_6] : memref<3xf32, #tpu.memory_space<smem>>
    %17 = vector.broadcast %16 : f32 to vector<1x256xf32>
    %18 = arith.addf %15, %17 : vector<1x256xf32>
    %c0_7 = arith.constant 0 : index
    %c0_8 = arith.constant 0 : index
    %c0_9 = arith.constant 0 : index
    %19 = vector.load %arg5[%c0_7, %c0_8, %c0_9] : memref<1x3x256xf32, #tpu.memory_space<vmem>>, vector<1x1x256xf32>
    %20 = vector.shape_cast %19 : vector<1x1x256xf32> to vector<1x256xf32>
    %21 = vector.shape_cast %18 : vector<1x256xf32> to vector<1x1x256xf32>
    tpu.vector_store %arg5[%c0_7, %c0_8, %c0_9], %21 {strides = array<i32>} : memref<1x3x256xf32, #tpu.memory_space<vmem>>, vector<1x1x256xf32>,
    %22 = vector.extract_strided_slice %1 {offsets = [0, 0], sizes = [1, 256], strides = [1, 1]} : vector<3x256xf32> to vector<1x256xf32>
    %c1_10 = arith.constant 1 : index
    %c0_11 = arith.constant 0 : index
    %23 = memref.load %arg3[%c1_10, %c0_11] : memref<3x3xf32, #tpu.memory_space<smem>>
    %24 = vector.broadcast %23 : f32 to vector<1x256xf32>
    %25 = arith.mulf %22, %24 : vector<1x256xf32>
    %26 = vector.extract_strided_slice %1 {offsets = [1, 0], sizes = [1, 256], strides = [1, 1]} : vector<3x256xf32> to vector<1x256xf32>
    %c1_12 = arith.constant 1 : index
    %c1_13 = arith.constant 1 : index
    %27 = memref.load %arg3[%c1_12, %c1_13] : memref<3x3xf32, #tpu.memory_space<smem>>
    %28 = vector.broadcast %27 : f32 to vector<1x256xf32>
    %29 = arith.mulf %26, %28 : vector<1x256xf32>
    %30 = arith.addf %25, %29 : vector<1x256xf32>
    %31 = vector.extract_strided_slice %1 {offsets = [2, 0], sizes = [1, 256], strides = [1, 1]} : vector<3x256xf32> to vector<1x256xf32>
    %c1_14 = arith.constant 1 : index
    %c2_15 = arith.constant 2 : index
    %32 = memref.load %arg3[%c1_14, %c2_15] : memref<3x3xf32, #tpu.memory_space<smem>>
    %33 = vector.broadcast %32 : f32 to vector<1x256xf32>
    %34 = arith.mulf %31, %33 : vector<1x256xf32>
    %35 = arith.addf %30, %34 : vector<1x256xf32>
    %c1_16 = arith.constant 1 : index
    %36 = memref.load %arg4[%c1_16] : memref<3xf32, #tpu.memory_space<smem>>
    %37 = vector.broadcast %36 : f32 to vector<1x256xf32>
    %38 = arith.addf %35, %37 : vector<1x256xf32>
    %c0_17 = arith.constant 0 : index
    %c1_18 = arith.constant 1 : index
    %c0_19 = arith.constant 0 : index
    %39 = vector.load %arg5[%c0_17, %c1_18, %c0_19] : memref<1x3x256xf32, #tpu.memory_space<vmem>>, vector<1x1x256xf32>
    %40 = vector.shape_cast %39 : vector<1x1x256xf32> to vector<1x256xf32>
    %41 = vector.shape_cast %38 : vector<1x256xf32> to vector<1x1x256xf32>
    tpu.vector_store %arg5[%c0_17, %c1_18, %c0_19], %41 {strides = array<i32>} : memref<1x3x256xf32, #tpu.memory_space<vmem>>, vector<1x1x256xf32>,
    %42 = vector.extract_strided_slice %1 {offsets = [0, 0], sizes = [1, 256], strides = [1, 1]} : vector<3x256xf32> to vector<1x256xf32>
    %c2_20 = arith.constant 2 : index
    %c0_21 = arith.constant 0 : index
    %43 = memref.load %arg3[%c2_20, %c0_21] : memref<3x3xf32, #tpu.memory_space<smem>>
    %44 = vector.broadcast %43 : f32 to vector<1x256xf32>
    %45 = arith.mulf %42, %44 : vector<1x256xf32>
    %46 = vector.extract_strided_slice %1 {offsets = [1, 0], sizes = [1, 256], strides = [1, 1]} : vector<3x256xf32> to vector<1x256xf32>
    %c2_22 = arith.constant 2 : index
    %c1_23 = arith.constant 1 : index
    %47 = memref.load %arg3[%c2_22, %c1_23] : memref<3x3xf32, #tpu.memory_space<smem>>
    %48 = vector.broadcast %47 : f32 to vector<1x256xf32>
    %49 = arith.mulf %46, %48 : vector<1x256xf32>
    %50 = arith.addf %45, %49 : vector<1x256xf32>
    %51 = vector.extract_strided_slice %1 {offsets = [2, 0], sizes = [1, 256], strides = [1, 1]} : vector<3x256xf32> to vector<1x256xf32>
    %c2_24 = arith.constant 2 : index
    %c2_25 = arith.constant 2 : index
    %52 = memref.load %arg3[%c2_24, %c2_25] : memref<3x3xf32, #tpu.memory_space<smem>>
    %53 = vector.broadcast %52 : f32 to vector<1x256xf32>
    %54 = arith.mulf %51, %53 : vector<1x256xf32>
    %55 = arith.addf %50, %54 : vector<1x256xf32>
    %c2_26 = arith.constant 2 : index
    %56 = memref.load %arg4[%c2_26] : memref<3xf32, #tpu.memory_space<smem>>
    %57 = vector.broadcast %56 : f32 to vector<1x256xf32>
    %58 = arith.addf %55, %57 : vector<1x256xf32>
    %c0_27 = arith.constant 0 : index
    %c2_28 = arith.constant 2 : index
    %c0_29 = arith.constant 0 : index
    %59 = vector.load %arg5[%c0_27, %c2_28, %c0_29] : memref<1x3x256xf32, #tpu.memory_space<vmem>>, vector<1x1x256xf32>
    %60 = vector.shape_cast %59 : vector<1x1x256xf32> to vector<1x256xf32>
    %61 = vector.shape_cast %58 : vector<1x256xf32> to vector<1x1x256xf32>
    tpu.vector_store %arg5[%c0_27, %c2_28, %c0_29], %61 {strides = array<i32>} : memref<1x3x256xf32, #tpu.memory_space<vmem>>, vector<1x1x256xf32>,
    return
  }
  func.func @transform_0(%arg0: i32, %arg1: i32) -> (i32, i32, i32) {
    %c0_i32 = arith.constant 0 : i32
    %c0_i32_0 = arith.constant 0 : i32
    return %arg0, %c0_i32, %arg1 : i32, i32, i32
  }
  func.func @transform_1(%arg0: i32, %arg1: i32) -> (i32, i32) {
    %c0_i32 = arith.constant 0 : i32
    %c0_i32_0 = arith.constant 0 : i32
    %c0_i32_1 = arith.constant 0 : i32
    return %c0_i32, %c0_i32_0 : i32, i32
  }
  func.func @transform_2(%arg0: i32, %arg1: i32) -> i32 {
    %c0_i32 = arith.constant 0 : i32
    %c0_i32_0 = arith.constant 0 : i32
    return %c0_i32 : i32
  }
  func.func @transform_3(%arg0: i32, %arg1: i32) -> (i32, i32, i32) {
    %c0_i32 = arith.constant 0 : i32
    %c0_i32_0 = arith.constant 0 : i32
    return %arg0, %c0_i32, %arg1 : i32, i32, i32
  }
}

</mosaic_0001>

<bundles_post_ra>
// kernel: tpu_custom_call.1
= control target key start
LH: loop header
LB: loop body
LE: loop exit
PB: predicated region body
PF: predicated region fallthrough
CT: control target
= control target key end

     0   :  { %8 = vsyncpa [#allocation3], 0  ;;  %s735_s0 = inlined_call_operand.vmem [shape: f32[2,3,256], index: 0, kind: input, shape index: {}]   ;;  %s736_s1 = inlined_call_operand.vmem [shape: f32[3,3], index: 1, kind: input, shape index: {}]   ;;  %s737_s2 = inlined_call_operand.vmem [shape: f32[3], index: 2, kind: input, shape index: {}]   ;;  %s738_s3 = inlined_call_operand.vmem [shape: f32[2,3,256], index: 3, kind: output, shape index: {}]  }
   0x1   :  { %9 = vsyncpa [#allocation5], 0  ;;  %s636_s12 = smov 0   ;;  %s638_s13 = smov 0  }
   0x2   :  { %s640_s14 = smov 0  }
   0x3 LB: > { %s470_s15 = sadd.s32 4294967295, %s611_s14   ;;  %s27_s16 = sadd.s32 1, %s607_s13  ;;  %s611_s14 = sphi %s640_s14, %s15_s14   ;;  %s607_s13 = sphi %s638_s13, %s750_s13   ;;  %s603_s12 = sphi %s636_s12, %s749_s12  }
   0x4   : > { %p29_p0 = scmp.ge.s32.totalorder %s27_s16, 2  ;;  %p472_p1 = scmp.ge.s32.totalorder %s611_s14, 1 }
   0x5   : > { %p130_p2 = scmp.lt.s32.totalorder %s611_s14, 3  ;;  %p661_p4 = scmp.eq.s32.totalorder %s470_s15, 0 }
   0x6   : > { %s752_s16 = smov (%p29_p0, %s27_s16), 0  ;;  %s143_s21 = sshll.u32 %s736_s1, 4  ;;  %s144_s21 = int_to_ptr.vmem [resolvable:$true] %s143_s21 }
   0x7   : > { %p657_p3 = pnand %p472_p1, %p130_p2  ;;  %s154_s24 = sshll.u32 %s737_s2, 4  ;;  %s155_s24 = int_to_ptr.vmem [resolvable:$true] %s154_s24 }
   0x8   : > { %s743_s18 = scalar_select %p661_p4, 1, 0 }
   0x9   : > { %s742_s17 = scalar_select %p657_p3, 1, 0 }
   0xa   : > { %p513_p5 = pneg %p657_p3  ;;  %s551_s26 = scalar_lea.vmem %s144_s21, 64 }
   0xb   : > { %p552_p7 = scmp.ne.s32.totalorder %s144_s21, %s551_s26  ;;  %p559_p11 = scmp.lt.s32.totalorder %s144_s21, %s144_s21 }
   0xc   : > { %p675_p6 = pnand %p661_p4, %p513_p5  ;;  %p560_p12 = scmp.lt.s32.totalorder %s551_s26, %s551_s26 }
   0xe   : > { %p553_p8 = pneg %p675_p6  ;;  %p561_p13 = por %p560_p12, %p559_p11 }
  0x10   : > { %p554_p9 = pnand %p553_p8, %p552_p7 }
  0x12   : > { %p555_p10 = pneg %p554_p9 }
  0x14   : > { %p562_p0 = pnand %p561_p13, %p555_p10 }
  0x16   : > { %565 = shalt.err (!%p562_p0)
}
  0x17   : > { %s613_s27 = smov [#allocation2]   ;;  %s566_s28 = scalar_lea.vmem %s155_s24, 16 }
  0x18   : > { %516 = dma.vmem_to_smem (!%p675_p6), %s144_s21, 64, %s613_s27, [#allocation3]  }
  0x19   : > { %p567_p1 = scmp.ne.s32.totalorder %s155_s24, %s566_s28  ;;  %p574_p4 = scmp.lt.s32.totalorder %s155_s24, %s155_s24 }
  0x1a   : > { %p575_p3 = scmp.lt.s32.totalorder %s566_s28, %s566_s28 }
  0x1b   : > { %p569_p2 = pnand %p567_p1, %p553_p8 }
  0x1c   : > { %p576_p7 = por %p575_p3, %p574_p4 }
  0x1d   : > { %p570_p5 = pneg %p569_p2 }
  0x1f   : > { %p577_p9 = pnand %p576_p7, %p570_p5 }
  0x21   : > { %580 = shalt.err (!%p577_p9)
}
  0x22   : > { %s614_s29 = smov [#allocation4]   ;;  %p745_p10 = scmp.ne.s32.totalorder %s742_s17, 0 }
  0x23   : > { %519 = dma.vmem_to_smem (!%p675_p6), %s155_s24, 16, %s614_s29, [#allocation5]  }
  0x24   : > { %180 = sbr.rel (%p745_p10) target bundleno = 77 (0x4d), region = 32  ;;  %p746_p11 = scmp.ne.s32.totalorder (!%p745_p10), %s743_s18, 0 }
  0x29   : > { %594 = dma.done.wait (%p746_p11), [#allocation3], 64  }
  0x2a   : > { %596 = vsyncadd (%p746_p11), [#allocation3], 4294967232 }
  0x2b   : > { %598 = dma.done.wait (%p746_p11), [#allocation5], 16  }
  0x2c   : > { %600 = vsyncadd (%p746_p11), [#allocation5], 4294967280 }
  0x2d   : > { %190 = sfence }
  0x2e   : > { %p218_p3 = scmp.lt.s32.totalorder %s603_s12, 1  ;;  %s238_s30 = sld [smem:[#allocation2]]  ;;  %v615_v0 = vmov 1966171168   ;;  %v264_v2 = vlaneseq }
  0x2f   : > { %s483_s4 = sld [smem:[#allocation2 + $0x1]]  ;;  %v262_v1 = vunpack.c.l.s4 %v615_v0 }
  0x30   : > { %s754_s12 = smov (!%p218_p3, %s603_s12), 1  ;;  %s485_s5 = sld [smem:[#allocation2 + $0x2]]  ;;  %v265_v10 = vshrl.u32 %v264_v2, 7  ;;  %vm715_vm0 = vcmp.lt.s32.totalorder %v264_v2, 256 }
  0x31   : > { %s503_s6 = sshll.u32 %s754_s12, 3  ;;  %s705_s10 = sld [smem:[#allocation4]]  ;;  %v263_v9 = vunpack.c.0.s8 %v262_v1 }
  0x32   : > { %s225_s9 = scalar_lea.vmem %s735_s0, %s503_s6  ;;  %s487_s11 = sld [smem:[#allocation2 + $0x80]] }
  0x33   : > { %v237_v3 = vld [vmem:[%s225_s9] sm:$0x77]  ;;  %s488_s15 = sld [smem:[#allocation2 + $0x81]]  ;;  %v266_v17 = vsub.s32 %v263_v9, %v265_v10  ;;  %s235_s25 = scalar_lea.vmem %s738_s3, %s503_s6 }
  0x34   : > { %v239_v4 = vstv %s238_s30  ;;  %s490_s17 = sld [smem:[#allocation2 + $0x82]] }
  0x35   : > { %v242_v5 = vstv %s483_s4  ;;  %v240_v6 = vmul.f32 %v239_v4, %v237_v3  ;;  %s707_s18 = sld [smem:[#allocation4 + $0x1]] }
  0x36   : > { %v243_v7 = vmul.f32 %v242_v5, %v237_v3  ;;  %v250_v8 = vstv %s485_s5  ;;  %s494_s19 = sld [smem:[#allocation2 + $0x100]] }
  0x37   : > { %v251_v12 = vmul.f32 %v250_v8, %v237_v3  ;;  %s495_s20 = sld [smem:[#allocation2 + $0x101]]  ;;  %v258_v16 = vstv %s705_s10 }
  0x38   : > { %v484_v11 = vrot.slane %v243_v7, 9  ;;  %v282_v15 = vstv %s487_s11  ;;  %s497_s21 = sld [smem:[#allocation2 + $0x102]] }
  0x39   : > { %v486_v14 = vrot.slane %v251_v12, 10  ;;  %v285_v18 = vstv %s488_s15  ;;  %v283_v20 = vmul.f32 %v282_v15, %v237_v3  ;;  %s499_s22 = sld [smem:[#allocation4 + $0x2]] }
  0x3a   : > { %v248_v13 = vadd.f32 %v484_v11, %v240_v6  ;;  %v286_v21 = vmul.f32 %v285_v18, %v237_v3  ;;  %v293_v22 = vstv %s490_s17 }
  0x3b   : > { %v294_v23 = vmul.f32 %v293_v22, %v237_v3  ;;  %v301_v35 = vstv %s707_s18 }
  0x3c   : > { %v256_v19 = vadd.f32 %v486_v14, %v248_v13  ;;  %v489_v25 = vrot.slane %v286_v21, 9  ;;  %v322_v26 = vstv %s494_s19 }
  0x3d   : > { %v491_v27 = vrot.slane %v294_v23, 10  ;;  %v323_v28 = vmul.f32 %v322_v26, %v237_v3  ;;  %v325_v29 = vstv %s495_s20 }
  0x3e   : > { %v259_v24 = vadd.f32 %v258_v16, %v256_v19  ;;  %v291_v31 = vadd.f32 %v489_v25, %v283_v20  ;;  %v326_v32 = vmul.f32 %v325_v29, %v237_v3  ;;  %v333_v33 = vstv %s497_s21 }
  0x3f   : > { %v334_v36 = vmul.f32 %v333_v33, %v237_v3  ;;  %v341_v43 = vstv %s499_s22 }
  0x40   : > { %v267_v30 = vrot.slane %v259_v24, %v266_v17  ;;  %v299_v38 = vadd.f32 %v491_v27, %v291_v31  ;;  %v496_v39 = vrot.slane %v326_v32, 9 }
  0x41   : > { %v498_v40 = vrot.slane %v334_v36, 10 }
  0x42   : > { %v274_v37 = vrot.slane %v267_v30, %v266_v17  ;;  %v302_v41 = vadd.f32 %v301_v35, %v299_v38  ;;  %v331_v42 = vadd.f32 %v496_v39, %v323_v28 }
  0x44   : > { %280 = vst.msk [vmem:[%s235_s25] ss:$4 sm:$0x3] %vm715_vm0, %v274_v37  ;;  %v310_v44 = vrot.slane %v302_v41, %v266_v17  ;;  %v339_v45 = vadd.f32 %v498_v40, %v331_v42 }
  0x46   : > { %v317_v46 = vrot.slane %v310_v44, %v266_v17  ;;  %v342_v47 = vadd.f32 %v341_v43, %v339_v45 }
  0x48   : > { %493 = vst.msk [vmem:[%s235_s25 + $0x1] ss:$4 sm:$0x3] %vm715_vm0, %v317_v46  ;;  %v350_v48 = vrot.slane %v342_v47, %v266_v17 }
  0x4a   : > { %v357_v49 = vrot.slane %v350_v48, %v266_v17 }
  0x4c   : > { %500 = vst.msk [vmem:[%s235_s25 + $0x2] ss:$4 sm:$0x3] %vm715_vm0, %v357_v49 }
  0x4d PF: > { %s15_s14 = sadd.s32 1, %s611_s14   ;;  %s749_s12 = smov %s607_s13 }
  0x4e   : > { %p12_p4 = scmp.ge.s32.totalorder %s15_s14, 4   ;;  %s750_s13 = smov %s752_s16 }
  0x50   :  { %14 = sbr.rel (!%p12_p4) target bundleno = 3 (0x3), region = 73 }
  0x55   :  { %391 = vsyncpa [#allocation3], 1 }
  0x56   :  { %393 = vsyncpa [#allocation3 + $0x1], 1 }
  0x57   :  { %394 = vsyncpa [#allocation5], 1 }

</bundles_post_ra>
